<compile_context>
chip_gen: v7x
topology: tpu7x:2x2x1
jax: 0.10.0
libtpu: 0.0.40
codegen_flags: <defaults>
</compile_context>

<pallas_src>
import functools

import jax
import jax.numpy as jnp
from jax import lax
from jax.experimental import pallas as pl
from jax.experimental.pallas import tpu as pltpu


def _soft_ce_kernel(n_ref, yhat_ref, y_ref, out_ref, *, inv_temp, batch_tile):
    """One batch tile: row-wise soft-CE, masked for out-of-range rows, reduced
    to a single per-tile partial written lane-dense into out_ref (1, 1, 128)."""
    i = pl.program_id(0)
    n_valid = n_ref[0]                                   # SMEM scalar

    yh = yhat_ref[...].astype(jnp.float32) * inv_temp    # (tn, C)
    yy = y_ref[...].astype(jnp.float32) * inv_temp       # (tn, C)

    # log-sum-exp of y_hat / T (numerically stable)
    m1 = jnp.max(yh, axis=1, keepdims=True)
    z1 = yh - m1                                         # (tn, C)
    lse1 = jnp.log(jnp.sum(jnp.exp(z1), axis=1, keepdims=True))   # (tn, 1)

    # softmax stats of y / T; weights sum to 1 per row, so
    #   row_loss = -sum(weight * (z1 - lse1)) = lse1 - sum(e2 * z1) / s2
    m2 = jnp.max(yy, axis=1, keepdims=True)
    e2 = jnp.exp(yy - m2)                                # (tn, C)
    s2 = jnp.sum(e2, axis=1, keepdims=True)              # (tn, 1)
    num = jnp.sum(e2 * z1, axis=1, keepdims=True)        # (tn, 1)
    row_loss = lse1 - num / s2                           # (tn, 1)

    # Mask rows past the valid range (covers the partial last block whose
    # extra rows read garbage).  MUST stay a select (jnp.where), not a
    # multiply-by-zero, so NaN/Inf from garbage rows cannot propagate.
    row_ids = lax.broadcasted_iota(jnp.int32, row_loss.shape, 0) + i * batch_tile
    row_loss = jnp.where(row_ids < n_valid, row_loss, 0.0)

    partial = jnp.sum(row_loss)                          # scalar for this tile
    out_ref[...] = jnp.full(out_ref.shape, partial, dtype=jnp.float32)


def _round_up(x, m):
    return -(-x // m) * m


def _round_down(x, m):
    return (x // m) * m


def _vmem_limit_bytes():
    """Generation-aware scoped-VMEM request (~25% headroom)."""
    try:
        cap = int(pltpu.get_tpu_info().vmem_capacity_bytes)
    except Exception:
        cap = 64 * 1024 * 1024            # v7x worst case
    return (cap * 3) // 4                 # ≈48 MiB v7x, ≈96 MiB v5e/v6e


def _choose_batch_tile(n, c, itemsize, vmem_limit, max_batch_tile=None):
    """Row tile sized by block bytes with lane-padding-aware VMEM accounting,
    capped to keep >=2 (ideally >=4) grid steps, bucketed to a power of two."""
    # Last dim pads to 128 lanes in VMEM.
    row_bytes = _round_up(c, 128) * itemsize
    # 2 inputs x 2 pipeline buffers must stay under ~half the scoped limit;
    # ~4 MiB blocks hit the measured HBM-roofline sweet spot.
    per_buffer_budget = min(4 * 1024 * 1024, vmem_limit // 8)
    by_bytes = max(8, _round_down(per_buffer_budget // row_bytes, 8))

    # Keep >=4 grid steps when N allows (megacore sharding + DMA overlap).
    n_pad8 = _round_up(n, 8)
    if n_pad8 >= 4 * 8:
        step_cap = max(8, _round_down(n_pad8 // 4, 8))
    elif n_pad8 >= 2 * 8:
        step_cap = max(8, _round_down(n_pad8 // 2, 8))
    else:
        step_cap = 8

    tile = min(by_bytes, step_cap, n_pad8)
    if max_batch_tile is not None:
        tile = min(tile, max(8, _round_down(int(max_batch_tile), 8)))
    # Bucket to a power of two (>=8) to limit recompilation across varying N.
    tile = max(8, 1 << (int(tile).bit_length() - 1))
    return tile


def soft_cross_entropy_loss(y_hat, y, temperature=0.3, reduction="sum",
                            max_batch_tile=None):
    """Pallas TPU implementation of SoftCrossEntropyLoss.forward.

    y_hat, y: (N, C) arrays (class axis = 1), f32 or bf16. Returns a scalar.
    """
    assert y_hat.shape == y.shape and y_hat.ndim == 2
    N, C = y_hat.shape
    itemsize = jnp.dtype(y_hat.dtype).itemsize

    vmem_limit = _vmem_limit_bytes()
    tile = _choose_batch_tile(N, C, itemsize, vmem_limit, max_batch_tile)
    num_tiles = pl.cdiv(N, tile)          # last block may be partial (masked)

    # TODO(synk): for very large C (>~0.5M f32 classes) tile the class axis too
    # (trailing 'arbitrary' grid axis, online-softmax running max/sum/num in
    # VMEM scratch) so full-row blocks fit v7x's 64 MiB VMEM.
    kernel = functools.partial(
        _soft_ce_kernel,
        inv_temp=float(1.0 / temperature),   # Python float -> jaxpr literal
        batch_tile=int(tile),
    )

    n_valid = jnp.array([N], dtype=jnp.int32)   # SMEM scalar, avoids baking N

    partials = pl.pallas_call(
        kernel,
        out_shape=jax.ShapeDtypeStruct((num_tiles, 1, 128), jnp.float32),
        grid_spec=pltpu.PrefetchScalarGridSpec(
            num_scalar_prefetch=1,
            grid=(num_tiles,),
            in_specs=[
                pl.BlockSpec((tile, C), lambda i, n_ref: (i, 0)),
                pl.BlockSpec((tile, C), lambda i, n_ref: (i, 0)),
            ],
            # Per-tile partial sums; last two block dims equal the full array
            # dims (1, 128) -> unmasked lane-dense stores, no carried scalar.
            out_specs=pl.BlockSpec((1, 1, 128), lambda i, n_ref: (i, 0, 0)),
        ),
        compiler_params=pltpu.CompilerParams(
            dimension_semantics=("parallel",),   # independent tiles -> megacore
            vmem_limit_bytes=vmem_limit,
        ),
        # If profiling shows exposed input DMA, add pipeline_mode=pl.Buffered(3)
        # on the in_specs (re-check the per-buffer VMEM budget).
    )(n_valid, y_hat, y)

    total = jnp.sum(partials[:, 0, 0])
    if reduction == "sum":
        return total
    # 'mean' over all elements of the ORIGINAL tensor, like torch loss.mean().
    return total / jnp.float32(N * C)


def _reference(y_hat, y, temperature=0.3, reduction="sum"):
    p = jax.nn.log_softmax(y_hat / temperature, axis=1)
    w = jax.nn.softmax(y / temperature, axis=1)
    loss = -(p * w)
    return loss.sum() if reduction == "sum" else loss.mean()


if __name__ == "__main__":
    key = jax.random.PRNGKey(0)
    k1, k2, k3, k4 = jax.random.split(key, 4)

    # Case 1: small aligned problem (N=16, C=32), both reductions.
    y_hat = jax.random.normal(k1, (16, 32), dtype=jnp.float32)
    y = jax.random.normal(k2, (16, 32), dtype=jnp.float32)
    out_sum = jax.block_until_ready(
        soft_cross_entropy_loss(y_hat, y, temperature=0.3, reduction="sum"))
    out_mean = jax.block_until_ready(
        soft_cross_entropy_loss(y_hat, y, temperature=0.3, reduction="mean"))
    assert jnp.allclose(out_sum, _reference(y_hat, y, 0.3, "sum"),
                        rtol=1e-4, atol=1e-4), (out_sum, _reference(y_hat, y, 0.3, "sum"))
    assert jnp.allclose(out_mean, _reference(y_hat, y, 0.3, "mean"),
                        rtol=1e-4, atol=1e-4), (out_mean, _reference(y_hat, y, 0.3, "mean"))

    # Case 2: ragged batch (N=13, C=40) — no padding copy; partial last block
    # is handled purely by the in-kernel row mask.
    a = jax.random.normal(k3, (13, 40), dtype=jnp.float32)
    b = jax.random.normal(k4, (13, 40), dtype=jnp.float32)
    out2 = jax.block_until_ready(
        soft_cross_entropy_loss(a, b, temperature=0.5, reduction="sum"))
    assert jnp.allclose(out2, _reference(a, b, 0.5, "sum"),
                        rtol=1e-4, atol=1e-4), (out2, _reference(a, b, 0.5, "sum"))

    # Case 3: multi-tile path (N=24, forced tile=8 -> 3 parallel partials).
    c1 = jax.random.normal(k1, (24, 32), dtype=jnp.float32)
    c2 = jax.random.normal(k2, (24, 32), dtype=jnp.float32)
    out3 = jax.block_until_ready(
        soft_cross_entropy_loss(c1, c2, temperature=0.3, reduction="sum",
                                max_batch_tile=8))
    assert jnp.allclose(out3, _reference(c1, c2, 0.3, "sum"),
                        rtol=1e-4, atol=1e-4), (out3, _reference(c1, c2, 0.3, "sum"))

    # Case 4: bf16 inputs (halved HBM traffic); kernel upcasts to f32 in VMEM.
    a16 = a.astype(jnp.bfloat16)
    b16 = b.astype(jnp.bfloat16)
    out4 = jax.block_until_ready(
        soft_cross_entropy_loss(a16, b16, temperature=0.5, reduction="sum"))
    ref4 = _reference(a16.astype(jnp.float32), b16.astype(jnp.float32), 0.5, "sum")
    assert jnp.allclose(out4, ref4, rtol=1e-3, atol=1e-3), (out4, ref4)

    print("KERNEL_OK")
</pallas_src>

<mosaic_0001>
module attributes {stable_mosaic.version = 11 : i64} {
  func.func @_soft_ce_kernel(%arg0: i32, %arg1: memref<1xi32, #tpu.memory_space<smem>>, %arg2: memref<8x32xf32, #tpu.memory_space<vmem>>, %arg3: memref<8x32xf32, #tpu.memory_space<vmem>>, %arg4: memref<1x1x128xf32, #tpu.memory_space<vmem>>) attributes {dimension_semantics = [#tpu.dimension_semantics<parallel>], iteration_bounds = array<i64: 2>, scalar_prefetch = 1 : i64, scratch_operands = 0 : i64, tpu.core_type = #tpu.core_type<tc>, window_params = [{transform_indices = @transform_0, window_bounds = array<i64: 8, 32>}, {transform_indices = @transform_1, window_bounds = array<i64: 8, 32>}, {transform_indices = @transform_2, window_bounds = array<i64: 1, 1, 128>}]} {
    %c0 = arith.constant 0 : index
    %0 = memref.load %arg1[%c0] : memref<1xi32, #tpu.memory_space<smem>>
    %c0_0 = arith.constant 0 : index
    %c0_1 = arith.constant 0 : index
    %1 = vector.load %arg2[%c0_0, %c0_1] : memref<8x32xf32, #tpu.memory_space<vmem>>, vector<8x32xf32>
    %cst = arith.constant 3.33333325 : f32
    %2 = vector.broadcast %cst : f32 to vector<8x32xf32>
    %3 = arith.mulf %1, %2 : vector<8x32xf32>
    %c0_2 = arith.constant 0 : index
    %c0_3 = arith.constant 0 : index
    %4 = vector.load %arg3[%c0_2, %c0_3] : memref<8x32xf32, #tpu.memory_space<vmem>>, vector<8x32xf32>
    %cst_4 = arith.constant 3.33333325 : f32
    %5 = vector.broadcast %cst_4 : f32 to vector<8x32xf32>
    %6 = arith.mulf %4, %5 : vector<8x32xf32>
    %cst_5 = arith.constant dense<0xFF800000> : vector<8xf32>
    %7 = vector.multi_reduction <maximumf>, %3, %cst_5 [1] : vector<8x32xf32> to vector<8xf32>
    %8 = vector.shape_cast %7 : vector<8xf32> to vector<8x1xf32>
    %9 = vector.broadcast %8 : vector<8x1xf32> to vector<8x32xf32>
    %10 = arith.subf %3, %9 : vector<8x32xf32>
    %11 = math.exp %10 : vector<8x32xf32>
    %cst_6 = arith.constant dense<0.000000e+00> : vector<8xf32>
    %12 = vector.multi_reduction <add>, %11, %cst_6 [1] : vector<8x32xf32> to vector<8xf32>
    %13 = vector.shape_cast %12 : vector<8xf32> to vector<8x1xf32>
    %14 = math.log %13 : vector<8x1xf32>
    %cst_7 = arith.constant dense<0xFF800000> : vector<8xf32>
    %15 = vector.multi_reduction <maximumf>, %6, %cst_7 [1] : vector<8x32xf32> to vector<8xf32>
    %16 = vector.shape_cast %15 : vector<8xf32> to vector<8x1xf32>
    %17 = vector.broadcast %16 : vector<8x1xf32> to vector<8x32xf32>
    %18 = arith.subf %6, %17 : vector<8x32xf32>
    %19 = math.exp %18 : vector<8x32xf32>
    %cst_8 = arith.constant dense<0.000000e+00> : vector<8xf32>
    %20 = vector.multi_reduction <add>, %19, %cst_8 [1] : vector<8x32xf32> to vector<8xf32>
    %21 = vector.shape_cast %20 : vector<8xf32> to vector<8x1xf32>
    %22 = arith.mulf %19, %10 : vector<8x32xf32>
    %cst_9 = arith.constant dense<0.000000e+00> : vector<8xf32>
    %23 = vector.multi_reduction <add>, %22, %cst_9 [1] : vector<8x32xf32> to vector<8xf32>
    %24 = vector.shape_cast %23 : vector<8xf32> to vector<8x1xf32>
    %25 = arith.divf %24, %21 : vector<8x1xf32>
    %26 = arith.subf %14, %25 : vector<8x1xf32>
    %27 = tpu.iota {dimensions = array<i32: 0>} : vector<8x1xi32>
    %c8_i32 = arith.constant 8 : i32
    %28 = arith.muli %arg0, %c8_i32 : i32
    %29 = vector.broadcast %28 : i32 to vector<8x1xi32>
    %30 = arith.addi %27, %29 : vector<8x1xi32>
    %31 = vector.broadcast %0 : i32 to vector<8x1xi32>
    %32 = arith.cmpi slt, %30, %31 : vector<8x1xi32>
    %cst_10 = arith.constant 0.000000e+00 : f32
    %33 = vector.broadcast %cst_10 : f32 to vector<8x1xf32>
    %34 = arith.select %32, %26, %33 : vector<8x1xi1>, vector<8x1xf32>
    %35 = vector.shape_cast %34 : vector<8x1xf32> to vector<1x8x1xf32>
    %cst_11 = arith.constant dense<0.000000e+00> : vector<1xf32>
    %36 = vector.multi_reduction <add>, %35, %cst_11 [1, 2] : vector<1x8x1xf32> to vector<1xf32>
    %37 = vector.shape_cast %36 : vector<1xf32> to vector<1x1x1xf32>
    %38 = vector.extract %37[0, 0, 0] : f32 from vector<1x1x1xf32>
    %39 = vector.broadcast %38 : f32 to vector<1x1x128xf32>
    %c0_12 = arith.constant 0 : index
    %c0_13 = arith.constant 0 : index
    %c0_14 = arith.constant 0 : index
    %40 = vector.load %arg4[%c0_12, %c0_13, %c0_14] : memref<1x1x128xf32, #tpu.memory_space<vmem>>, vector<1x1x128xf32>
    tpu.vector_store %arg4[%c0_12, %c0_13, %c0_14], %39 {strides = array<i32>} : memref<1x1x128xf32, #tpu.memory_space<vmem>>, vector<1x1x128xf32>,
    return
  }
  func.func @transform_0(%arg0: i32, %arg1: memref<1xi32, #tpu.memory_space<smem>>) -> (i32, i32) {
    %c0_i32 = arith.constant 0 : i32
    %c0_i32_0 = arith.constant 0 : i32
    return %arg0, %c0_i32 : i32, i32
  }
  func.func @transform_1(%arg0: i32, %arg1: memref<1xi32, #tpu.memory_space<smem>>) -> (i32, i32) {
    %c0_i32 = arith.constant 0 : i32
    %c0_i32_0 = arith.constant 0 : i32
    return %arg0, %c0_i32 : i32, i32
  }
  func.func @transform_2(%arg0: i32, %arg1: memref<1xi32, #tpu.memory_space<smem>>) -> (i32, i32, i32) {
    %c0_i32 = arith.constant 0 : i32
    %c0_i32_0 = arith.constant 0 : i32
    %c0_i32_1 = arith.constant 0 : i32
    return %arg0, %c0_i32, %c0_i32_0 : i32, i32, i32
  }
}

</mosaic_0001>

<bundles_post_ra>
// kernel: tpu_custom_call.1
= control target key start
LH: loop header
LB: loop body
LE: loop exit
PB: predicated region body
PF: predicated region fallthrough
CT: control target
= control target key end

     0   :  { %s802_s0 = inlined_call_operand.<no memory space> [shape: s32[1], index: 0, kind: input, shape index: {}]   ;;  %s803_s1 = inlined_call_operand.hbm [shape: f32[16,32], index: 1, kind: input, shape index: {}]   ;;  %s804_s2 = inlined_call_operand.hbm [shape: f32[16,32], index: 2, kind: input, shape index: {}]   ;;  %s805_s3 = inlined_call_operand.hbm [shape: f32[2,1,128], index: 3, kind: output, shape index: {}]  }
   0x1   :  { %8 = sst [smem:[#allocation3]] %s802_s0 }
   0x2   :  { %9 = vsyncpa [#allocation5], 0 }
   0x3   :  { %11 = vsyncpa [#allocation5 + $0x1], 0 }
   0x4   :  { %12 = vsyncpa [#allocation8], 0 }
   0x5   :  { %14 = vsyncpa [#allocation8 + $0x1], 0 }
   0x6   :  { %15 = vsyncpa [#allocation6], 0 }
   0x7   :  { %17 = vsyncpa [#allocation6 + $0x1], 0  ;;  %s586_s14 = smov 0   ;;  %s588_s15 = smov 0  }
   0x8   :  { %s590_s16 = smov 0   ;;  %s592_s17 = smov 0  }
   0x9 LB: > { %s607_s0 = sadd.s32 4294967295, %s558_s17   ;;  %s353_s18 = sadd.s32 4294967294, %s558_s17   ;;  %s558_s17 = sphi %s592_s17, %s824_s17   ;;  %s554_s16 = sphi %s590_s16, %s823_s16   ;;  %s550_s15 = sphi %s588_s15, %s822_s15   ;;  %s546_s14 = sphi %s586_s14, %s821_s14  }
   0xa   : > { %s611_s19 = sadd.s32 1, %s558_s17   ;;  %s30_s20 = sadd.s32 1, %s554_s16 }
   0xb   : > { %s27_s21 = ssub.s32 %s558_s17, %s611_s19  ;;  %p37_p0 = scmp.ne.s32.totalorder %s554_s16, %s550_s15 }
   0xc   : > { %p28_p1 = scmp.eq.s32.totalorder %s27_s21, 0  ;;  %p38_p2 = scmp.eq.s32.totalorder %s558_s17, 0 }
   0xd   : > { %p43_p3 = scmp.ne.s32.totalorder %s550_s15, %s546_s14  ;;  %p44_p4 = scmp.eq.s32.totalorder %s607_s0, 0 }
   0xe   : > { %s623_s22 = scalar_select %p28_p1, %s554_s16, %s30_s20  }
   0xf   : > { %p625_p5 = por %p38_p2, %p37_p0  ;;  %p629_p6 = por %p44_p4, %p43_p3 }
  0x10   : > { %p93_p7 = scmp.eq.s32.totalorder %s607_s0, 1  ;;  %p99_p8 = scmp.eq.s32.totalorder %s353_s18, 1 }
  0x11   : > { %s809_s24 = scalar_select %p629_p6, 1, 0 }
  0x12   : > { %p386_p10 = scmp.lt.s32.totalorder %s558_s17, 2  ;;  %p636_p11 = por %p93_p7, %p37_p0 }
  0x13   : > { %p640_p12 = por %p99_p8, %p43_p3  ;;  %s645_s27 = sand.u32 1, %s554_s16  }
  0x14   : > { %s810_s25 = scalar_select %p636_p11, 1, 0 }
  0x15   : > { %s811_s26 = scalar_select %p640_p12, 1, 0 }
  0x16   : > { %s357_s28 = sshll.u32 %s558_s17, 7  ;;  %s356_s29 = sshll.u32 %s645_s27, 3 }
  0x17   : > { %s654_s5 = scalar_lea.hbm %s803_s1, %s357_s28  ;;  %s123_s6 = scalar_lea.vmem [#allocation4], %s356_s29 }
  0x18   : > { %s130_s7 = sshll.u32 %s123_s6, 4  ;;  %p660_p13 = pnand %p386_p10, %p625_p5  ;;  %s664_s7 = int_to_ptr.vmem [resolvable:$true] %s130_s7 }
  0x19   : > { %s120_s9 = scalar_lea.sflag [#allocation5], %s645_s27  ;;  %s428_s10 = scalar_lea.hbm %s654_s5, 128 }
  0x1a   : > { %p429_p2 = scmp.ne.s32.totalorder %s654_s5, %s428_s10  ;;  %p430_p3 = pneg %p660_p13 }
  0x1b   : > { %s433_s13 = scalar_lea.hbm %s803_s1, 256  ;;  %p434_p5 = scmp.lt.u32.totalorder %s654_s5, %s803_s1 }
  0x1c   : > { %p431_p4 = pnand %p430_p3, %p429_p2  ;;  %p435_p8 = scmp.lt.u32.totalorder %s433_s13, %s428_s10 }
  0x1d   : > { %p437_p9 = scmp.lt.u32.totalorder %s428_s10, %s654_s5 }
  0x1e   : > { %p432_p7 = pneg %p431_p4  ;;  %p436_p10 = por %p435_p8, %p434_p5 }
  0x20   : > { %p438_p0 = por %p437_p9, %p436_p10 }
  0x22   : > { %p439_p1 = pnand %p438_p0, %p432_p7 }
  0x24   : > { %442 = shalt.err (!%p439_p1)
}
  0x25   : > { %s443_s21 = scalar_lea.vmem %s664_s7, 128  ;;  %s560_s23 = smov [#allocation4]  }
  0x26   : > { %p444_p2 = scmp.ne.s32.totalorder %s664_s7, %s443_s21  ;;  %s448_s30 = sshll.u32 %s560_s23, 4  ;;  %s449_s30 = int_to_ptr.vmem [resolvable:$false] %s448_s30 }
  0x27   : > { %s450_s4 = scalar_lea.vmem %s449_s30, 256  ;;  %p451_p11 = scmp.lt.s32.totalorder %s664_s7, %s449_s30 }
  0x28   : > { %p446_p4 = pnand %p444_p2, %p430_p3  ;;  %p452_p5 = scmp.lt.s32.totalorder %s450_s4, %s443_s21 }
  0x2a   : > { %p447_p12 = pneg %p446_p4  ;;  %p453_p8 = por %p452_p5, %p451_p11 }
  0x2c   : > { %p454_p9 = pnand %p453_p8, %p447_p12 }
  0x2e   : > { %457 = shalt.err (!%p454_p9)
}
  0x2f   : > { %378 = dma.hbm_to_vmem [thread:$0]  (!%p660_p13), %s654_s5, 128, %s664_s7, %s120_s9  }
  0x30   : > { %p813_p0 = scmp.lt.s32.totalorder %s558_s17, 3  ;;  %p814_p1 = scmp.ge.s32.totalorder %s558_s17, 1 }
  0x31   : > { %s707_s12 = scalar_lea.hbm %s804_s2, %s357_s28  ;;  %s141_s13 = scalar_lea.vmem [#allocation7], %s356_s29 }
  0x32   : > { %p698_p7 = pnand %p814_p1, %p813_p0  ;;  %s148_s18 = sshll.u32 %s141_s13, 4  ;;  %s149_s18 = int_to_ptr.vmem [resolvable:$true] %s148_s18 }
  0x33   : > { %s138_s5 = scalar_lea.sflag [#allocation8], %s645_s27  ;;  %s458_s7 = scalar_lea.hbm %s707_s12, 128 }
  0x34   : > { %s815_s6 = scalar_select %p698_p7, 1, 0 }
  0x35   : > { %p459_p11 = scmp.ne.s32.totalorder %s707_s12, %s458_s7  ;;  %s463_s28 = scalar_lea.hbm %s804_s2, 256 }
  0x36   : > { %p464_p2 = scmp.lt.u32.totalorder %s707_s12, %s804_s2  ;;  %p465_p4 = scmp.lt.u32.totalorder %s463_s28, %s458_s7 }
  0x37   : > { %p461_p12 = pnand %p459_p11, %p430_p3  ;;  %p467_p8 = scmp.lt.u32.totalorder %s458_s7, %s707_s12 }
  0x38   : > { %p466_p5 = por %p465_p4, %p464_p2 }
  0x39   : > { %p462_p10 = pneg %p461_p12 }
  0x3a   : > { %p468_p9 = por %p467_p8, %p466_p5 }
  0x3c   : > { %p469_p0 = pnand %p468_p9, %p462_p10 }
  0x3e   : > { %472 = shalt.err (!%p469_p0)
}
  0x3f   : > { %s473_s27 = scalar_lea.vmem %s149_s18, 128  ;;  %s561_s29 = smov [#allocation7]  }
  0x40   : > { %p474_p1 = scmp.ne.s32.totalorder %s149_s18, %s473_s27  ;;  %s478_s30 = sshll.u32 %s561_s29, 4  ;;  %s479_s30 = int_to_ptr.vmem [resolvable:$false] %s478_s30 }
  0x41   : > { %s480_s4 = scalar_lea.vmem %s479_s30, 256  ;;  %p481_p6 = scmp.lt.s32.totalorder %s149_s18, %s479_s30 }
  0x42   : > { %p476_p11 = pnand %p474_p1, %p430_p3  ;;  %p482_p7 = scmp.lt.s32.totalorder %s480_s4, %s473_s27 }
  0x44   : > { %p477_p12 = pneg %p476_p11  ;;  %p483_p2 = por %p482_p7, %p481_p6 }
  0x46   : > { %p484_p4 = pnand %p483_p2, %p477_p12 }
  0x48   : > { %487 = shalt.err (!%p484_p4)
}
  0x49   : > { %381 = dma.hbm_to_vmem [thread:$0]  (!%p660_p13), %s707_s12, 128, %s149_s18, %s138_s5  }
  0x4a   : > { %p816_p10 = scmp.ne.s32.totalorder %s815_s6, 0 }
  0x4b   : > { %s734_s10 = sand.u32 (!%p816_p10), 1, %s550_s15   ;;  %p817_p3 = scmp.ne.s32.totalorder (!%p816_p10), %s809_s24, 0 }
  0x4c   : > { %157 = sbr.rel (%p816_p10) target bundleno = 630 (0x276), region = 28  ;;  %s361_s11 = sshll.u32 (!%p816_p10), %s734_s10, 3 }
  0x4d   : > { %s160_s13 = scalar_lea.sflag (!%p816_p10), [#allocation5], %s734_s10  ;;  %s163_s7 = scalar_lea.vmem (!%p816_p10), [#allocation4], %s361_s11 }
  0x53   : > { %533 = dma.done.wait (%p817_p3), %s160_s13, 128  }
  0x54   : > { %535 = vsyncadd (%p817_p3), %s160_s13, 4294967168  ;;  %s169_s8 = scalar_lea.sflag [#allocation8], %s734_s10  ;;  %s172_s12 = scalar_lea.vmem [#allocation7], %s361_s11 }
  0x55   : > { %537 = dma.done.wait (%p817_p3), %s169_s8, 128  }
  0x56   : > { %539 = vsyncadd (%p817_p3), %s169_s8, 4294967168  ;;  %v198_v0 = vld [vmem:[%s163_s7] sm:$0xff]  ;;  %vm202_vm0 = vcmask 261120   ;;  %v200_v1 = vld [vmem:[%s172_s12] sm:$0xff]  ;;  %v230_v20 = vlaneseq  ;;  %s197_s24 = sld [smem:[#allocation3]]  ;;  %s363_s6 = sshll.u32 %s607_s0, 3 }
  0x57   : > { %v199_v2 = vmul.f32 3.3333333, %v198_v0  ;;  %v201_v3 = vmul.f32 3.3333333, %v200_v1  ;;  %v233_v22 = vstv %s363_s6  ;;  %vm238_vm2 = vcmask 7168   ;;  %s196_s18 = scalar_lea.vmem [#allocation9], %s734_s10 }
  0x58   : > { %v231_v21 = vshrl.u32 %v230_v20, 7  ;;  %s264_s5 = sshll.u32 %s196_s18, 4  ;;  %s364_s9 = sshll.u32 %s607_s0, 4  ;;  %s755_s5 = int_to_ptr.vmem [resolvable:$true] %s264_s5 }
  0x59   : > { %v203_v4 = vsel %vm202_vm0, %v199_v2, -inf  ;;  %v214_v5 = vsel %vm202_vm0, %v201_v3, -inf  ;;  %s760_s23 = scalar_lea.hbm %s805_s3, %s364_s9  ;;  %s252_s27 = scalar_lea.sflag [#allocation6], %s734_s10 }
  0x5a   : > { %204 = vmax.xlane.f32.xlu0 %v203_v4  ;;  %v234_v24 = vadd.s32 %v233_v22, %v231_v21  ;;  %s488_s29 = scalar_lea.vmem %s755_s5, 16  ;;  %p818_p13 = scmp.ne.s32.totalorder %s810_s25, 0 }
  0x5b   : > { %p489_p6 = scmp.ne.s32.totalorder %s755_s5, %s488_s29  ;;  %s562_s0 = smov [#allocation9]  }
  0x5c   : > { %v235_v25 = vstv %s197_s24  ;;  %s492_s30 = sshll.u32 %s562_s0, 4  ;;  %s493_s30 = int_to_ptr.vmem [resolvable:$false] %s492_s30 }
  0x5d   : > { %vm236_vm1 = vcmp.lt.s32.totalorder %v234_v24, %v235_v25  ;;  %p490_p7 = pnand %p489_p6, %p818_p13  ;;  %s494_s4 = scalar_lea.vmem %s493_s30, 32 }
  0x5e   : > { %215 = vmax.xlane.f32.xlu0 %v214_v5  ;;  %p495_p8 = scmp.lt.s32.totalorder %s755_s5, %s493_s30  ;;  %p496_p9 = scmp.lt.s32.totalorder %s494_s4, %s488_s29 }
  0x5f   : > { %p491_p5 = pneg %p490_p7 }
  0x60   : > { %p497_p0 = por %p496_p9, %p495_p8 }
  0x62   : > { %p498_p1 = pnand %p497_p0, %p491_p5 }
  0xe7   : > { %v205_v6 = vpop.xlane.xlu0 %204 }
  0xe8   : > { %v206_v7 = vsub.f32 %v199_v2, %v205_v6 }
  0xea   : > { %v207_v8 = vmul.f32 1.442695, %v206_v7 }
  0xeb   : > { %v216_v9 = vpop.xlane.xlu0 %215 }
  0xec   : > { %420 = vpow2.f32 %v207_v8  ;;  %v217_v10 = vsub.f32 %v201_v3, %v216_v9 }
  0xee   : > { %v218_v11 = vmul.f32 1.442695, %v217_v10 }
  0xf0   : > { %422 = vpow2.f32 %v218_v11 }
  0xf6   : > { %v421_v12 = vpop.eup %420 }
  0xf7   : > { %v209_v13 = vsel %vm202_vm0, %v421_v12, 0.0 }
  0xf8   : > { %210 = vadd.xlane.f32.xlu1 %v209_v13 }
  0xfa   : > { %v423_v14 = vpop.eup %422 }
  0xfb   : > { %v220_v15 = vsel %vm202_vm0, %v423_v14, 0.0  ;;  %v223_v16 = vmul.f32 %v423_v14, %v206_v7 }
  0xfc   : > { %221 = vadd.xlane.f32.xlu1 %v220_v15 }
  0xfd   : > { %v224_v17 = vsel %vm202_vm0, %v223_v16, 0.0 }
  0xfe   : > { %225 = vadd.xlane.f32.xlu0 %v224_v17 }
 0x185   : > { %v211_v18 = vpop.xlane.xlu1 %210 }
 0x186   : > { %424 = vlog2.f32 %v211_v18 }
 0x189   : > { %v222_v19 = vpop.xlane.xlu1 %221 }
 0x18a   : > { %426 = vrcp.f32 %v222_v19 }
 0x18b   : > { %v226_v27 = vpop.xlane.xlu0 %225 }
 0x190   : > { %v425_v23 = vpop.eup %424 }
 0x191   : > { %v213_v28 = vmul.f32 0.6931472, %v425_v23 }
 0x194   : > { %v427_v26 = vpop.eup %426 }
 0x195   : > { %v228_v29 = vmul.f32 %v427_v26, %v226_v27 }
 0x197   : > { %v229_v30 = vsub.f32 %v213_v28, %v228_v29 }
 0x199   : > { %v237_v31 = vsel %vm236_vm1, %v229_v30, 0.0 }
 0x19a   : > { %v239_v32 = vsel %vm238_vm2, %v237_v31, 0.0 }
 0x19b   : > { %240 = vadd.xlane.f32.xlu1 %v239_v32 }
 0x228   : > { %v241_v33 = vpop.xlane.xlu1 %240 }
 0x229   : > { %v242_v34 = vrot.slane %v241_v33, 4 }
 0x22b   : > { %v243_v35 = vadd.f32 %v242_v34, %v241_v33 }
 0x22d   : > { %v244_v36 = vrot.slane %v243_v35, 2 }
 0x22f   : > { %v245_v37 = vadd.f32 %v244_v36, %v243_v35 }
 0x231   : > { %v246_v38 = vrot.slane %v245_v37, 1 }
 0x233   : > { %v247_v39 = vadd.f32 %v246_v38, %v245_v37 }
 0x235   : > { %367 = vpush %v247_v39 }
 0x266   : > { %s368_s20 = spop %367 }
 0x267   : > { %v249_v40 = vstv %s368_s20 }
 0x268   : > { %250 = vst [vmem:[%s196_s18] sm:$0x1] %v249_v40 }
 0x269   : > { %501 = shalt.err (!%p498_p1)
}
 0x26a   : > { %s502_s10 = scalar_lea.hbm %s760_s23, 16  ;;  %s506_s7 = scalar_lea.hbm %s805_s3, 32 }
 0x26b   : > { %p503_p11 = scmp.ne.s32.totalorder %s760_s23, %s502_s10  ;;  %p507_p4 = scmp.lt.u32.totalorder %s760_s23, %s805_s3 }
 0x26c   : > { %p508_p10 = scmp.lt.u32.totalorder %s506_s7, %s502_s10  ;;  %p510_p6 = scmp.lt.u32.totalorder %s502_s10, %s760_s23 }
 0x26d   : > { %p504_p12 = pnand %p503_p11, %p818_p13 }
 0x26e   : > { %p509_p3 = por %p508_p10, %p507_p4 }
 0x26f   : > { %p505_p2 = pneg %p504_p12 }
 0x270   : > { %p511_p7 = por %p510_p6, %p509_p3 }
 0x272   : > { %p512_p5 = pnand %p511_p7, %p505_p2 }
 0x274   : > { %515 = shalt.err (!%p512_p5)
}
 0x275   : > { %373 = dma.vmem_to_hbm [thread:$0]  (%p818_p13), %s755_s5, 16, %s760_s23, %s252_s27  }
 0x276 PF: > { %s276_s24 = sand.u32 1, %s546_s14   ;;  %p819_p8 = scmp.ne.s32.totalorder %s811_s26, 0 }
 0x277   : > { %p820_p9 = scmp.ge.s32.totalorder %s558_s17, 2  ;;  %s277_s6 = scalar_lea.sflag [#allocation6], %s276_s24 }
 0x279   : > { %p383_p0 = pnand %p820_p9, %p819_p8 }
 0x27b   : > { %541 = dma.done.wait (!%p383_p0), %s277_s6, 16  }
 0x27c   : > { %543 = vsyncadd (!%p383_p0), %s277_s6, 4294967280  ;;  %p20_p1 = scmp.ge.s32.totalorder %s611_s19, 4   ;;  %s821_s14 = smov %s550_s15 }
 0x27d   : > { %s822_s15 = smov %s554_s16  ;;  %s823_s16 = smov %s623_s22 }
 0x27e   : > { %s824_s17 = smov %s611_s19  ;;  %22 = sbr.rel (!%p20_p1) target bundleno = 9 (0x9), region = 86 }
 0x285   :  { %281 = vsyncpa [#allocation5], 1 }
 0x286   :  { %283 = vsyncpa [#allocation5 + $0x1], 1 }
 0x287   :  { %284 = vsyncpa [#allocation8], 1 }
 0x288   :  { %286 = vsyncpa [#allocation8 + $0x1], 1 }
 0x289   :  { %287 = vsyncpa [#allocation6], 1 }
 0x28a   :  { %289 = vsyncpa [#allocation6 + $0x1], 1 }

</bundles_post_ra>
